<compile_context>
chip_gen: v7x
topology: tpu7x:2x2x1
jax: 0.10.0
libtpu: 0.0.40
codegen_flags: <defaults>
</compile_context>

<pallas_src>
import jax
import jax.numpy as jnp
from jax.experimental import pallas as pl
from jax.experimental.pallas import tpu as pltpu


_LANE = 128      # TPU lane width: output last dim padded to a multiple of this
_SUBLANE = 8     # TPU sublane width: row tiles kept a multiple of this


def _spiralconv_matmul_kernel(x_ref, w_ref, b_ref, o_ref):
    # x_ref: (TM, in_features)     one row-tile of gathered spiral neighborhoods
    # w_ref: (in_features, N_pad)  transposed + lane-padded Linear weight (resident)
    # b_ref: (1, N_pad)            fp32 bias (resident)
    # o_ref: (TM, N_pad)
    acc = jnp.dot(x_ref[...], w_ref[...], preferred_element_type=jnp.float32)
    o_ref[...] = (acc + b_ref[...]).astype(o_ref.dtype)


def _round_up(v, m):
    return -(-v // m) * m


def _pick_tile_rows(rows, in_features, n_pad, x_itemsize, out_itemsize,
                    vmem_tile_budget=8 * 1024 * 1024):
    """Largest row tile whose double-buffered in+out tiles fit the VMEM budget.

    The 8 MiB budget is conservative for all generations (v5e 16 MiB scoped
    default, v7x 64 MiB physical), leaving room for the resident weight/bias.
    """
    per_row = 2 * (in_features * x_itemsize + n_pad * out_itemsize)
    tm = vmem_tile_budget // max(per_row, 1)
    tm = max(_SUBLANE, min(int(tm), 2048))
    tm = (tm // _SUBLANE) * _SUBLANE
    tm = min(tm, _round_up(rows, _SUBLANE))
    return max(tm, _SUBLANE)


def spiral_conv(x, indices, weight, bias, dim=1, *, compute_dtype=None):
    """Pallas implementation of SpiralConv.forward.

    x             : (n_verts, in_channels) or (bs, n_verts, in_channels)
    indices       : (n_nodes, seq_length) int32 spiral indices into the vertex axis
    weight        : (out_channels, in_channels * seq_length)  (PyTorch Linear layout)
    bias          : (out_channels,)
    compute_dtype : optional dtype (e.g. jnp.bfloat16) for the MXU inputs;
                    accumulation and bias add stay fp32, output keeps x.dtype.
    returns       : (n_nodes, out_channels) or (bs, n_nodes, out_channels)
    """
    n_nodes, seq_length = indices.shape
    out_channels, in_features = weight.shape
    flat_idx = indices.reshape(-1)

    out_dtype = x.dtype

    if x.ndim == 2:
        # torch.index_select(x, 0, idx).view(n_nodes, -1)
        gathered = jnp.take(x, flat_idx, axis=0).reshape(n_nodes, in_features)
        rows = n_nodes
        batched = False
        bs = None
    elif x.ndim == 3:
        bs = x.shape[0]
        # torch.index_select(x, dim=1, idx).view(bs, n_nodes, -1)
        gathered = jnp.take(x, flat_idx, axis=dim).reshape(bs * n_nodes, in_features)
        rows = bs * n_nodes
        batched = True
    else:
        raise RuntimeError(
            "x.dim() is expected to be 2 or 3, but received {}".format(x.ndim))

    # TODO(synk): the spiral gather is still materialized in HBM by plain-JAX
    # jnp.take; an in-kernel dynamic row gather from a VMEM-resident x (or XLA
    # input fusion of the take) would cut HBM traffic ~seq_length x, but dynamic
    # vector gathers are not reliably lowerable in Mosaic today.

    if compute_dtype is not None:
        gathered = gathered.astype(compute_dtype)
        w = weight.astype(compute_dtype)
    else:
        w = weight

    # --- Lane-dense output: pad out_channels to a multiple of 128 -------------
    n_pad = _round_up(out_channels, _LANE)
    w_t = w.T                                        # (in_features, out_channels)
    if n_pad != out_channels:
        w_t = jnp.pad(w_t, ((0, 0), (0, n_pad - out_channels)))
    b2d = jnp.zeros((1, n_pad), jnp.float32).at[0, :out_channels].set(
        bias.astype(jnp.float32))

    # --- Row (M) tiling --------------------------------------------------------
    x_itemsize = jnp.dtype(gathered.dtype).itemsize
    out_itemsize = jnp.dtype(out_dtype).itemsize
    tm = _pick_tile_rows(rows, in_features, n_pad, x_itemsize, out_itemsize)
    rows_pad = _round_up(rows, tm)
    if rows_pad != rows:
        gathered = jnp.pad(gathered, ((0, rows_pad - rows), (0, 0)))

    grid = (rows_pad // tm,)

    cost = pl.CostEstimate(
        flops=2 * rows * in_features * out_channels,
        transcendentals=0,
        bytes_accessed=(rows_pad * in_features * x_itemsize      # gathered x
                        + in_features * n_pad * x_itemsize       # weight
                        + rows_pad * n_pad * out_itemsize),      # output
    )

    out = pl.pallas_call(
        _spiralconv_matmul_kernel,
        out_shape=jax.ShapeDtypeStruct((rows_pad, n_pad), out_dtype),
        grid_spec=pltpu.PrefetchScalarGridSpec(
            num_scalar_prefetch=0,
            grid=grid,
            in_specs=[
                # row tile of gathered activations: pipelined over the grid
                pl.BlockSpec((tm, in_features), lambda i: (i, 0)),
                # weight / bias: constant block -> VMEM-resident across steps
                pl.BlockSpec((in_features, n_pad), lambda i: (0, 0)),
                pl.BlockSpec((1, n_pad), lambda i: (0, 0)),
            ],
            out_specs=pl.BlockSpec((tm, n_pad), lambda i: (i, 0)),
        ),
        compiler_params=pltpu.CompilerParams(
            # Row tiles are independent -> shard across TensorCores (v7x has 2).
            dimension_semantics=("parallel",),
            # >= v5e's 16 MiB scoped default, <= v7x's 64 MiB physical VMEM.
            vmem_limit_bytes=32 * 1024 * 1024,
        ),
        cost_estimate=cost,
    )(gathered, w_t, b2d)

    out = out[:rows, :out_channels]
    if batched:
        out = out.reshape(bs, n_nodes, out_channels)
    return out


def init_spiralconv_params(key, in_channels, out_channels, seq_length,
                           dtype=jnp.float32):
    """Matches SpiralConv.reset_parameters(): xavier_uniform_ weight, zero bias."""
    in_features = in_channels * seq_length
    bound = (6.0 / (in_features + out_channels)) ** 0.5
    weight = jax.random.uniform(
        key, (out_channels, in_features), dtype=dtype, minval=-bound, maxval=bound
    )
    bias = jnp.zeros((out_channels,), dtype=dtype)
    return weight, bias


if __name__ == "__main__":
    # Small shapes consistent with the module.
    bs = 2
    n_verts = 16          # vertices in the mesh / rows of x
    in_channels = 4
    seq_length = 8        # spiral neighborhood length
    out_channels = 32
    n_nodes = n_verts     # one spiral per vertex

    key = jax.random.PRNGKey(0)
    k_x, k_idx, k_w = jax.random.split(key, 3)

    x = jax.random.normal(k_x, (bs, n_verts, in_channels), dtype=jnp.float32)
    indices = jax.random.randint(
        k_idx, (n_nodes, seq_length), minval=0, maxval=n_verts, dtype=jnp.int32
    )
    weight, bias = init_spiralconv_params(k_w, in_channels, out_channels, seq_length)

    # Reference (same math as the PyTorch forward), fp32.
    gathered_ref = jnp.take(x, indices.reshape(-1), axis=1).reshape(bs, n_nodes, -1)
    ref = gathered_ref @ weight.T + bias

    # --- default fp32 path (bitwise-comparable semantics to the module) -------
    out = jax.block_until_ready(spiral_conv(x, indices, weight, bias, dim=1))
    assert out.shape == (bs, n_nodes, out_channels), out.shape
    assert jnp.allclose(out, ref, atol=1e-5, rtol=1e-5)

    # --- 2-D (unbatched) path --------------------------------------------------
    out2 = jax.block_until_ready(spiral_conv(x[0], indices, weight, bias))
    ref2 = (jnp.take(x[0], indices.reshape(-1), axis=0).reshape(n_nodes, -1)
            @ weight.T + bias)
    assert out2.shape == (n_nodes, out_channels), out2.shape
    assert jnp.allclose(out2, ref2, atol=1e-5, rtol=1e-5)

    # --- bf16 MXU path (fp32 accumulate + bias, downcast only on inputs) -------
    out_bf16 = jax.block_until_ready(
        spiral_conv(x, indices, weight, bias, dim=1, compute_dtype=jnp.bfloat16))
    assert out_bf16.shape == (bs, n_nodes, out_channels), out_bf16.shape
    assert jnp.allclose(out_bf16, ref, atol=5e-2, rtol=5e-2)

    print("KERNEL_OK")
</pallas_src>

<mosaic_0001>
module attributes {stable_mosaic.version = 11 : i64} {
  func.func @_spiralconv_matmul_kernel(%arg0: i32, %arg1: memref<32x32xf32, #tpu.memory_space<vmem>>, %arg2: memref<32x128xf32, #tpu.memory_space<vmem>>, %arg3: memref<1x128xf32, #tpu.memory_space<vmem>>, %arg4: memref<32x128xf32, #tpu.memory_space<vmem>>) attributes {dimension_semantics = [#tpu.dimension_semantics<parallel>], iteration_bounds = array<i64: 1>, scalar_prefetch = 0 : i64, scratch_operands = 0 : i64, tpu.core_type = #tpu.core_type<tc>, window_params = [{transform_indices = @transform_0, window_bounds = array<i64: 32, 32>}, {pipeline_mode = #tpu.pipeline_mode<synchronous>, transform_indices = @transform_1, window_bounds = array<i64: 32, 128>}, {pipeline_mode = #tpu.pipeline_mode<synchronous>, transform_indices = @transform_2, window_bounds = array<i64: 1, 128>}, {transform_indices = @transform_3, window_bounds = array<i64: 32, 128>}]} {
    %c0 = arith.constant 0 : index
    %c0_0 = arith.constant 0 : index
    %0 = vector.load %arg1[%c0, %c0_0] : memref<32x32xf32, #tpu.memory_space<vmem>>, vector<32x32xf32>
    %c0_1 = arith.constant 0 : index
    %c0_2 = arith.constant 0 : index
    %1 = vector.load %arg2[%c0_1, %c0_2] : memref<32x128xf32, #tpu.memory_space<vmem>>, vector<32x128xf32>
    %cst = arith.constant dense<0.000000e+00> : vector<32x128xf32>
    %2 = tpu.matmul %0, %1, %cst {dimension_numbers = #tpu.dot_dimension_numbers<[1], [0], [0], [1], [0, 0, 1, 1], [], []>} : vector<32x32xf32>, vector<32x128xf32>, vector<32x128xf32> -> vector<32x128xf32>
    %c0_3 = arith.constant 0 : index
    %c0_4 = arith.constant 0 : index
    %3 = vector.load %arg3[%c0_3, %c0_4] : memref<1x128xf32, #tpu.memory_space<vmem>>, vector<1x128xf32>
    %4 = vector.broadcast %3 : vector<1x128xf32> to vector<32x128xf32>
    %5 = arith.addf %2, %4 : vector<32x128xf32>
    %c0_5 = arith.constant 0 : index
    %c0_6 = arith.constant 0 : index
    %6 = vector.load %arg4[%c0_5, %c0_6] : memref<32x128xf32, #tpu.memory_space<vmem>>, vector<32x128xf32>
    tpu.vector_store %arg4[%c0_5, %c0_6], %5 {strides = array<i32>} : memref<32x128xf32, #tpu.memory_space<vmem>>, vector<32x128xf32>,
    return
  }
  func.func @transform_0(%arg0: i32) -> (i32, i32) {
    %c0_i32 = arith.constant 0 : i32
    %c0_i32_0 = arith.constant 0 : i32
    return %arg0, %c0_i32 : i32, i32
  }
  func.func @transform_1(%arg0: i32) -> (i32, i32) {
    %c0_i32 = arith.constant 0 : i32
    %c0_i32_0 = arith.constant 0 : i32
    %c0_i32_1 = arith.constant 0 : i32
    return %c0_i32, %c0_i32_0 : i32, i32
  }
  func.func @transform_2(%arg0: i32) -> (i32, i32) {
    %c0_i32 = arith.constant 0 : i32
    %c0_i32_0 = arith.constant 0 : i32
    %c0_i32_1 = arith.constant 0 : i32
    return %c0_i32, %c0_i32_0 : i32, i32
  }
  func.func @transform_3(%arg0: i32) -> (i32, i32) {
    %c0_i32 = arith.constant 0 : i32
    %c0_i32_0 = arith.constant 0 : i32
    return %arg0, %c0_i32 : i32, i32
  }
}

</mosaic_0001>

<bundles_post_ra>
// kernel: tpu_custom_call.1
= control target key start
LH: loop header
LB: loop body
LE: loop exit
PB: predicated region body
PF: predicated region fallthrough
CT: control target
= control target key end

     0   :  { %8 = vsyncpa [#allocation3], 0  ;;  %s371_s0 = inlined_call_operand.hbm [shape: f32[32,32], index: 0, kind: input, shape index: {}]   ;;  %s372_s1 = inlined_call_operand.hbm [shape: f32[32,128], index: 1, kind: input, shape index: {}]   ;;  %s373_s2 = inlined_call_operand.vmem [shape: f32[1,128], index: 2, kind: input, shape index: {}]   ;;  %s374_s3 = inlined_call_operand.hbm [shape: f32[32,128], index: 3, kind: output, shape index: {}]  }
   0x1   :  { %9 = vsyncpa [#allocation6], 0 }
   0x2   :  { %10 = vsyncpa [#allocation4], 0  ;;  %s294_s12 = smov [#allocation2]   ;;  %s222_s16 = scalar_lea.hbm %s371_s0, 512 }
   0x3   :  { %s16_s13 = sshll.u32 %s294_s12, 4  ;;  %p223_p0 = scmp.ne.s32.totalorder %s371_s0, %s222_s16  ;;  %s17_s13 = int_to_ptr.vmem [resolvable:$true] %s16_s13 }
   0x4   :  { %p226_p1 = scmp.lt.u32.totalorder %s222_s16, %s371_s0 }
   0x6   :  { %p228_p2 = pnand %p226_p1, %p223_p0 }
   0x8   :  { %231 = shalt.err (!%p228_p2)
}
   0x9   :  { %s232_s21 = scalar_lea.vmem %s17_s13, 512  ;;  %p237_p4 = scmp.lt.s32.totalorder %s17_s13, %s17_s13 }
   0xa   :  { %p233_p3 = scmp.ne.s32.totalorder %s17_s13, %s232_s21  ;;  %p238_p5 = scmp.lt.s32.totalorder %s232_s21, %s232_s21 }
   0xc   :  { %p239_p6 = por %p238_p5, %p237_p4 }
   0xe   :  { %p240_p7 = pnand %p239_p6, %p233_p3 }
  0x10   :  { %243 = shalt.err (!%p240_p7)
}
  0x11   :  { %s295_s22 = smov 128   ;;  %s296_s23 = smov 8  }
  0x12   :  { %22 = dma.hbm_to_vmem [thread:$0]  %s371_s0, 512, %s17_s13, [#allocation3], %s295_s22, %s295_s22, %s296_s23  }
  0x13   :  { %s297_s26 = smov [#allocation5]   ;;  %s244_s30 = scalar_lea.hbm %s372_s1, 512 }
  0x14   :  { %s28_s27 = sshll.u32 %s297_s26, 4  ;;  %p245_p8 = scmp.ne.s32.totalorder %s372_s1, %s244_s30  ;;  %s29_s27 = int_to_ptr.vmem [resolvable:$true] %s28_s27 }
  0x15   :  { %p248_p9 = scmp.lt.u32.totalorder %s244_s30, %s372_s1 }
  0x17   :  { %p250_p10 = pnand %p248_p9, %p245_p8 }
  0x19   :  { %253 = shalt.err (!%p250_p10)
}
  0x1a   :  { %s254_s8 = scalar_lea.vmem %s29_s27, 512  ;;  %p259_p12 = scmp.lt.s32.totalorder %s29_s27, %s29_s27 }
  0x1b   :  { %p255_p11 = scmp.ne.s32.totalorder %s29_s27, %s254_s8  ;;  %p260_p13 = scmp.lt.s32.totalorder %s254_s8, %s254_s8 }
  0x1d   :  { %p261_p0 = por %p260_p13, %p259_p12 }
  0x1f   :  { %p262_p1 = pnand %p261_p0, %p255_p11 }
  0x21   :  { %265 = shalt.err (!%p262_p1)
}
  0x22   :  { %34 = dma.hbm_to_vmem [thread:$0]  %s372_s1, 512, %s29_s27, [#allocation6], %s295_s22, %s295_s22, %s296_s23  }
  0x23   :  { %288 = dma.done.wait [#allocation3], 512  }
  0x24   :  { %289 = vsyncadd [#allocation3], 4294966784 }
  0x25   :  { %290 = dma.done.wait [#allocation6], 512  }
  0x26   :  { %291 = vsyncadd [#allocation6], 4294966784  ;;  %vm58_vm0 = vcmask 261120   ;;  %v47_v0 = vld [vmem:[#allocation5] sm:$0xff]  ;;  %v48_v1 = vld [vmem:[#allocation5 + $0x8] sm:$0xff]  ;;  %s298_s11 = smov [#allocation7]  }
  0x27   :  { %v49_v2 = vld [vmem:[#allocation5 + $0x10] sm:$0xff]  ;;  %v205_v3 = vpack.c.bf16 %v48_v1, %v47_v0  ;;  %v50_v4 = vld [vmem:[#allocation5 + $0x18] sm:$0xff]  ;;  %v43_v5 = vld [vmem:[#allocation2] sm:$0xff]  ;;  %s165_s12 = sshll.u32 %s298_s11, 4  ;;  %s166_s12 = int_to_ptr.vmem [resolvable:$true] %s165_s12 }
  0x28   :  { %v45_v6 = vld [vmem:[#allocation2 + $0x10] sm:$0xff]  ;;  %v209_v7 = vpack.c.bf16 %v50_v4, %v49_v2  ;;  %199 = vmatprep.mubr.msk.f32.mxu0 %vm58_vm0, %v43_v5  ;;  %v44_v8 = vld [vmem:[#allocation2 + $0x8] sm:$0xff]  ;;  %v46_v9 = vld [vmem:[#allocation2 + $0x18] sm:$0xff]  ;;  %s266_s13 = scalar_lea.vmem %s166_s12, 512  ;;  %p271_p3 = scmp.lt.s32.totalorder %s166_s12, %s166_s12 }
  0x29   :  { %202 = vmatprep.mubr.msk.f32.mxu1 %vm58_vm0, %v45_v6  ;;  %206 = vmatprep.subr.bf16.mxu0 %v205_v3  ;;  %v178_v10 = vld [vmem:[%s373_s2] ss:$0 sm:$0xff]  ;;  %p267_p2 = scmp.ne.s32.totalorder %s166_s12, %s266_s13  ;;  %p272_p4 = scmp.lt.s32.totalorder %s266_s13, %s266_s13 }
  0x2a   :  { %213 = vmatprep.subr.bf16.mxu1 %v205_v3  ;;  %208 = vmatpush3.bf16.msra.mxu0 %v205_v3 }
  0x2b   :  { %215 = vmatpush3.bf16.msra.mxu1 %v205_v3  ;;  %210 = vmatprep.subr.bf16.mxu0 %v209_v7  ;;  %p273_p5 = por %p272_p4, %p271_p3 }
  0x2c   :  { %214 = vmatprep.subr.bf16.mxu1 %v209_v7 }
  0x2d   :  { %p274_p6 = pnand %p273_p5, %p267_p2 }
  0x2e   :  { %212 = vmatpush3.bf16.msra.mxu0 %v209_v7 }
  0x2f   :  { %216 = vmatpush3.bf16.msra.mxu1 %v209_v7 }
  0x31   :  { %200 = vmatmul.mubr.msk.f32.vlgmr.msra.gmra.mrb[0].mxu0 %vm58_vm0, %v44_v8 }
  0x32   :  { %203 = vmatmul.mubr.msk.f32.vlgmr.msra.gmra.mrb[0].mxu1 %vm58_vm0, %v46_v9 }
 0x104   :  { %v201_v11 = vpop.f32.mrb[0].mxu0 }
 0x105   :  { %v204_v12 = vpop.f32.mrb[0].mxu1  ;;  %v143_v13 = vadd.f32 %v201_v11, %v178_v10  ;;  %v137_v15 = vpop.f32.mrb[1].mxu0 }
 0x106   :  { %v153_v14 = vadd.f32 %v204_v12, %v178_v10  ;;  %v147_v16 = vpop.f32.mrb[1].mxu1  ;;  %v138_v17 = vadd.f32 %v178_v10, %v137_v15 }
 0x107   :  { %v148_v18 = vadd.f32 %v178_v10, %v147_v16  ;;  %157 = vst [vmem:[#allocation7 + $0x8] sm:$0xff] %v143_v13 }
 0x108   :  { %159 = vst [vmem:[#allocation7 + $0x18] sm:$0xff] %v153_v14  ;;  %156 = vst [vmem:[#allocation7] sm:$0xff] %v138_v17 }
 0x109   :  { %158 = vst [vmem:[#allocation7 + $0x10] sm:$0xff] %v148_v18 }
 0x10a   :  { %277 = shalt.err (!%p274_p6)
}
 0x10b   :  { %s278_s15 = scalar_lea.hbm %s374_s3, 512 }
 0x10c   :  { %p279_p7 = scmp.ne.s32.totalorder %s374_s3, %s278_s15  ;;  %p282_p8 = scmp.lt.u32.totalorder %s278_s15, %s374_s3 }
 0x10e   :  { %p284_p9 = pnand %p282_p8, %p279_p7 }
 0x110   :  { %287 = shalt.err (!%p284_p9)
}
 0x111   :  { %171 = dma.vmem_to_hbm [thread:$0]  %s166_s12, 512, %s374_s3, [#allocation4], %s295_s22, %s295_s22, %s296_s23  }
 0x112   :  { %292 = dma.done.wait [#allocation4], 512  }
 0x113   :  { %293 = vsyncadd [#allocation4], 4294966784 }
 0x114   :  { %175 = vsyncpa [#allocation3], 1 }
 0x115   :  { %176 = vsyncpa [#allocation6], 1 }
 0x116   :  { %177 = vsyncpa [#allocation4], 1 }

</bundles_post_ra>
